<compile_context>
chip_gen: v7x
topology: tpu7x:2x2x1
jax: 0.10.0
libtpu: 0.0.40
codegen_flags: <defaults>
</compile_context>

<pallas_src>
import jax
import jax.numpy as jnp
from jax import lax
from jax.experimental import pallas as pl
from jax.experimental.pallas import tpu as pltpu


# ---------------------------------------------------------------------------
# Embedding: DMA row gather via scalar prefetch.
# ---------------------------------------------------------------------------
def _embed_gather_kernel(ids_ref, row_ref, out_ref):
    del ids_ref                      # only used by the index maps
    out_ref[...] = row_ref[...]      # pure DMA-driven row copy


def embed_time_major_flat(y, table):
    """y: (B, T) int32, table: (V, E) f32 -> (T*B, E) f32, time-major-flat."""
    B, T = y.shape
    V, E = table.shape
    ids = jnp.transpose(y).reshape(T * B).astype(jnp.int32)   # time-major order
    table3 = table.reshape(V, 1, E)                           # (1, E) tiles
    out = pl.pallas_call(
        _embed_gather_kernel,
        out_shape=jax.ShapeDtypeStruct((T * B, 1, E), jnp.float32),
        grid_spec=pltpu.PrefetchScalarGridSpec(
            num_scalar_prefetch=1,
            grid=(T * B,),
            in_specs=[pl.BlockSpec((1, 1, E), lambda i, ids: (ids[i], 0, 0))],
            out_specs=pl.BlockSpec((1, 1, E), lambda i, ids: (i, 0, 0)),
        ),
        compiler_params=pltpu.CompilerParams(
            dimension_semantics=("arbitrary",)),
    )(ids, table3)
    # NOTE: out-of-range ids would be a DMA bounds issue (PyTorch would raise).
    return out.reshape(T * B, E)


# ---------------------------------------------------------------------------
# Hoisted input projection: one big MXU matmul for both directions, all steps.
# ---------------------------------------------------------------------------
def _input_proj_kernel(x_ref, w_ref, b_ref, out_ref):
    # x_ref: (T*B, Din)  w_ref: (Din, 8H)  b_ref: (1, 8H)  out_ref: (T*B, 8H)
    out_ref[...] = (jnp.dot(x_ref[...], w_ref[...],
                            preferred_element_type=jnp.float32) + b_ref[...])


# ---------------------------------------------------------------------------
# Fused bidirectional LSTM recurrence (time-major), both directions per step.
# ---------------------------------------------------------------------------
def _bilstm_recurrence_kernel(xw_ref, whh_ref, out_ref, h_sc, c_sc):
    # xw_ref:  (T, B, 8H) hoisted input projection (+bias); fwd gates [0:4H],
    #                     bwd gates [4H:8H]; gate order [i, f, g, o].
    # whh_ref: (2H, 8H)   block-diagonal recurrent weights (fwd | bwd).
    # out_ref: (T, B, 2H) fwd hidden in [..., :H], bwd hidden in [..., H:].
    # h_sc/c_sc: (B, 2H)  carried state, fwd in [:, :H], bwd in [:, H:].
    T = xw_ref.shape[0]
    H = xw_ref.shape[2] // 8

    h_sc[...] = jnp.zeros_like(h_sc)
    c_sc[...] = jnp.zeros_like(c_sc)

    def cell(gates, c_prev):
        i = jax.nn.sigmoid(gates[:, 0 * H:1 * H])
        f = jax.nn.sigmoid(gates[:, 1 * H:2 * H])
        g = jnp.tanh(gates[:, 2 * H:3 * H])
        o = jax.nn.sigmoid(gates[:, 3 * H:4 * H])
        c_new = f * c_prev + i * g
        h_new = o * jnp.tanh(c_new)
        return h_new, c_new

    def step(t, carry):
        # Single recurrent dot for BOTH directions (block-diagonal W_hh).
        rec = jnp.dot(h_sc[...], whh_ref[...],
                      preferred_element_type=jnp.float32)          # (B, 8H)
        xw_f = xw_ref[t]                 # forward reads time t
        xw_b = xw_ref[T - 1 - t]         # backward reads time T-1-t (in-kernel reverse)
        c_prev = c_sc[...]
        h_f, c_f = cell(xw_f[:, 0:4 * H] + rec[:, 0:4 * H], c_prev[:, 0:H])
        h_b, c_b = cell(xw_b[:, 4 * H:8 * H] + rec[:, 4 * H:8 * H],
                        c_prev[:, H:2 * H])
        h_sc[...] = jnp.concatenate([h_f, h_b], axis=-1)
        c_sc[...] = jnp.concatenate([c_f, c_b], axis=-1)
        out_ref[t, :, 0:H] = h_f
        out_ref[T - 1 - t, :, H:2 * H] = h_b
        return carry

    # Fully unroll the (small, static) time loop for scheduler visibility.
    lax.fori_loop(0, T, step, 0, unroll=True)
    # TODO(synk): gate slices are 32-lane sub-vregs (H < 128); lane-padding H to
    # 128 would make the gate math / stores unmasked for large state sizes.


def bilstm_layer(x_flat, T, B, wih_cat, whh_blk, b_cat):
    """x_flat: (T*B, Din) time-major-flat -> (T*B, 2H) time-major-flat."""
    H = whh_blk.shape[0] // 2
    # (1) hoisted input projection: one matmul for both directions, all steps.
    xw = pl.pallas_call(
        _input_proj_kernel,
        out_shape=jax.ShapeDtypeStruct((T * B, 8 * H), jnp.float32),
        in_specs=[pl.BlockSpec(memory_space=pltpu.MemorySpace.VMEM)] * 3,
        out_specs=pl.BlockSpec(memory_space=pltpu.MemorySpace.VMEM),
    )(x_flat, wih_cat, b_cat)
    # (2) fused bidirectional recurrence, lane-dense (T, B, 2H) output slab.
    # TODO(synk): for long sequences, grid over T with @pl.when-gated state init
    # and pipelined xw/out blocks instead of whole-array VMEM residency.
    out = pl.pallas_call(
        _bilstm_recurrence_kernel,
        out_shape=jax.ShapeDtypeStruct((T, B, 2 * H), jnp.float32),
        in_specs=[pl.BlockSpec(memory_space=pltpu.MemorySpace.VMEM)] * 2,
        out_specs=pl.BlockSpec(memory_space=pltpu.MemorySpace.VMEM),
        scratch_shapes=[pltpu.VMEM((B, 2 * H), jnp.float32),
                        pltpu.VMEM((B, 2 * H), jnp.float32)],
    )(xw.reshape(T, B, 8 * H), whh_blk)
    return out.reshape(T * B, 2 * H)


# ---------------------------------------------------------------------------
# TextEncoder forward: embedding + num_layers bidirectional LSTM layers.
# ---------------------------------------------------------------------------
def text_encoder_forward(y, params, num_layers):
    B, T = y.shape
    x = embed_time_major_flat(y, params["emb"])               # (T*B, E)
    for l in range(num_layers):
        wih_cat, whh_blk, b_cat = params["lstm"][l]
        x = bilstm_layer(x, T, B, wih_cat, whh_blk, b_cat)    # (T*B, 2H)
    H2 = x.shape[1]
    return jnp.transpose(x.reshape(T, B, H2), (1, 0, 2))      # (B, T, 2H)


# ---------------------------------------------------------------------------
# Pure-JAX reference (for verification), consumes the same packed params.
# ---------------------------------------------------------------------------
def ref_forward(y, params, num_layers):
    x = jnp.take(params["emb"], y, axis=0)                    # (B, T, E)
    for l in range(num_layers):
        wih_cat, whh_blk, b_cat = params["lstm"][l]
        H = whh_blk.shape[0] // 2
        dirs = [(wih_cat[:, :4 * H], whh_blk[:H, :4 * H], b_cat[0, :4 * H]),
                (wih_cat[:, 4 * H:], whh_blk[H:, 4 * H:], b_cat[0, 4 * H:])]
        outs = []
        for d, (wih, whh, b) in enumerate(dirs):
            xs = x if d == 0 else x[:, ::-1]
            B = x.shape[0]

            def step(carry, x_t):
                h, c = carry
                gates = x_t @ wih + h @ whh + b
                i = jax.nn.sigmoid(gates[:, :H])
                f = jax.nn.sigmoid(gates[:, H:2 * H])
                g = jnp.tanh(gates[:, 2 * H:3 * H])
                o = jax.nn.sigmoid(gates[:, 3 * H:])
                c = f * c + i * g
                h = o * jnp.tanh(c)
                return (h, c), h

            init = (jnp.zeros((B, H), jnp.float32),
                    jnp.zeros((B, H), jnp.float32))
            _, hs = lax.scan(step, init, jnp.transpose(xs, (1, 0, 2)))
            hs = jnp.transpose(hs, (1, 0, 2))
            if d == 1:
                hs = hs[:, ::-1]
            outs.append(hs)
        x = jnp.concatenate(outs, axis=-1)
    return x


# ---------------------------------------------------------------------------
# Deterministic parameter construction (mirrors nn.Embedding / nn.LSTM shapes),
# packed for the fused kernels:
#   wih_cat: (Din, 8H)  = [W_ih_fwd^T | W_ih_bwd^T]
#   whh_blk: (2H, 8H)   block-diagonal [W_hh_fwd^T, W_hh_bwd^T]
#   b_cat:   (1, 8H)    = [b_ih_fwd + b_hh_fwd | b_ih_bwd + b_hh_bwd]
# ---------------------------------------------------------------------------
def make_params(key, char_dim, emb_dim, state_size, num_layers):
    H = state_size
    k_emb, key = jax.random.split(key)
    params = {"emb": jax.random.normal(k_emb, (char_dim, emb_dim), jnp.float32),
              "lstm": []}
    bound = 1.0 / jnp.sqrt(H)
    for l in range(num_layers):
        din = emb_dim if l == 0 else 2 * H
        wih_parts, b_parts = [], []
        whh_blk = jnp.zeros((2 * H, 8 * H), jnp.float32)
        for d in range(2):
            key, k1, k2, k3, k4 = jax.random.split(key, 5)
            w_ih = jax.random.uniform(k1, (4 * H, din), jnp.float32, -bound, bound)
            w_hh = jax.random.uniform(k2, (4 * H, H), jnp.float32, -bound, bound)
            b_ih = jax.random.uniform(k3, (4 * H,), jnp.float32, -bound, bound)
            b_hh = jax.random.uniform(k4, (4 * H,), jnp.float32, -bound, bound)
            wih_parts.append(w_ih.T)
            b_parts.append(b_ih + b_hh)
            whh_blk = whh_blk.at[d * H:(d + 1) * H,
                                 d * 4 * H:(d + 1) * 4 * H].set(w_hh.T)
        wih_cat = jnp.concatenate(wih_parts, axis=1)          # (din, 8H)
        b_cat = jnp.concatenate(b_parts).reshape(1, 8 * H)
        params["lstm"].append((wih_cat, whh_blk, b_cat))
    return params


if __name__ == "__main__":
    char_dim, emb_dim, state_size, num_layers = 20, 16, 32, 2
    batch, seq = 2, 8

    key = jax.random.PRNGKey(0)
    k_tok, k_par = jax.random.split(key)
    y = jax.random.randint(k_tok, (batch, seq), 0, char_dim, dtype=jnp.int32)
    params = make_params(k_par, char_dim, emb_dim, state_size, num_layers)

    out = text_encoder_forward(y, params, num_layers)
    out = jax.block_until_ready(out)

    ref = jax.block_until_ready(ref_forward(y, params, num_layers))

    assert out.shape == (batch, seq, 2 * state_size), out.shape
    assert bool(jnp.all(jnp.isfinite(out)))
    assert jnp.allclose(out, ref, atol=5e-2, rtol=5e-2), (
        float(jnp.max(jnp.abs(out - ref))))
    print("KERNEL_OK")
</pallas_src>

<mosaic_0001>
module attributes {stable_mosaic.version = 11 : i64} {
  func.func @_embed_gather_kernel(%arg0: i32, %arg1: memref<16xi32, #tpu.memory_space<smem>>, %arg2: memref<1x1x16xf32, #tpu.memory_space<vmem>>, %arg3: memref<1x1x16xf32, #tpu.memory_space<vmem>>) attributes {dimension_semantics = [#tpu.dimension_semantics<arbitrary>], iteration_bounds = array<i64: 16>, scalar_prefetch = 1 : i64, scratch_operands = 0 : i64, tpu.core_type = #tpu.core_type<tc>, window_params = [{transform_indices = @transform_0, window_bounds = array<i64: 1, 1, 16>}, {transform_indices = @transform_1, window_bounds = array<i64: 1, 1, 16>}]} {
    %c0 = arith.constant 0 : index
    %c0_0 = arith.constant 0 : index
    %c0_1 = arith.constant 0 : index
    %0 = vector.load %arg2[%c0, %c0_0, %c0_1] : memref<1x1x16xf32, #tpu.memory_space<vmem>>, vector<1x1x16xf32>
    %c0_2 = arith.constant 0 : index
    %c0_3 = arith.constant 0 : index
    %c0_4 = arith.constant 0 : index
    %1 = vector.load %arg3[%c0_2, %c0_3, %c0_4] : memref<1x1x16xf32, #tpu.memory_space<vmem>>, vector<1x1x16xf32>
    tpu.vector_store %arg3[%c0_2, %c0_3, %c0_4], %0 {strides = array<i32>} : memref<1x1x16xf32, #tpu.memory_space<vmem>>, vector<1x1x16xf32>,
    return
  }
  func.func @transform_0(%arg0: i32, %arg1: memref<16xi32, #tpu.memory_space<smem>>) -> (i32, i32, i32) {
    %0 = arith.index_cast %arg0 : i32 to index
    %1 = memref.load %arg1[%0] : memref<16xi32, #tpu.memory_space<smem>>
    %c0_i32 = arith.constant 0 : i32
    %c0_i32_0 = arith.constant 0 : i32
    %c0_i32_1 = arith.constant 0 : i32
    return %1, %c0_i32, %c0_i32_0 : i32, i32, i32
  }
  func.func @transform_1(%arg0: i32, %arg1: memref<16xi32, #tpu.memory_space<smem>>) -> (i32, i32, i32) {
    %c0_i32 = arith.constant 0 : i32
    %c0_i32_0 = arith.constant 0 : i32
    %c0_i32_1 = arith.constant 0 : i32
    return %arg0, %c0_i32, %c0_i32_0 : i32, i32, i32
  }
}

</mosaic_0001>

<bundles_post_ra>
// kernel: tpu_custom_call.1
= control target key start
LH: loop header
LB: loop body
LE: loop exit
PB: predicated region body
PF: predicated region fallthrough
CT: control target
= control target key end

     0   :  { %s429_s0 = inlined_call_operand.vmem [shape: s32[16], index: 0, kind: input, shape index: {}]   ;;  %s430_s1 = inlined_call_operand.vmem [shape: f32[20,1,16], index: 1, kind: input, shape index: {}]   ;;  %s431_s2 = inlined_call_operand.hbm [shape: f32[16,1,16], index: 2, kind: output, shape index: {}]  }
   0x1   :  { %s7_s11 = sshll.u32 %s429_s0, 4  ;;  %s8_s11 = int_to_ptr.vmem [resolvable:$true] %s7_s11 }
   0x2   :  { %s237_s12 = scalar_lea.vmem %s8_s11, 16  ;;  %p242_p1 = scmp.lt.s32.totalorder %s8_s11, %s8_s11 }
   0x3   :  { %p238_p0 = scmp.ne.s32.totalorder %s8_s11, %s237_s12  ;;  %p243_p2 = scmp.lt.s32.totalorder %s237_s12, %s237_s12 }
   0x5   :  { %p244_p3 = por %p243_p2, %p242_p1 }
   0x7   :  { %p245_p4 = pnand %p244_p3, %p238_p0 }
   0x9   :  { %248 = shalt.err (!%p245_p4)  }
   0xa   :  { %s315_s13 = smov [#allocation3]  }
   0xb   :  { %10 = dma.vmem_to_smem %s8_s11, 16, %s315_s13, [#allocation2] }
   0xc   :  { %293 = dma.done.wait [#allocation2], 16 }
   0xd   :  { %294 = vsyncadd [#allocation2], 4294967280 }
   0xe   :  { %12 = sfence }
   0xf   :  { %13 = vsyncpa [#allocation5], 0 }
  0x10   :  { %15 = vsyncpa [#allocation5 + $0x1], 0  ;;  %s335_s14 = smov 0   ;;  %s337_s15 = smov 0  }
  0x11   :  { %s339_s0 = smov 0   ;;  %s341_s16 = smov 0  }
  0x12 LB: > { %s189_s17 = sadd.s32 4294967295, %s313_s16   ;;  %s190_s18 = sadd.s32 4294967294, %s313_s16   ;;  %s313_s16 = sphi %s341_s16, %s437_s16   ;;  %s309_s0 = sphi %s339_s0, %s436_s0   ;;  %s305_s15 = sphi %s337_s15, %s435_s15   ;;  %s301_s14 = sphi %s335_s14, %s434_s14  }
  0x13   : > { %s358_s19 = sadd.s32 1, %s313_s16   ;;  %s56_s20 = sadd.s32 1, %s309_s0 }
  0x14   : > { %s53_s21 = ssub.s32 %s313_s16, %s358_s19  ;;  %p66_p5 = scmp.ne.s32.totalorder %s309_s0, %s305_s15 }
  0x15   : > { %p54_p6 = scmp.eq.s32.totalorder %s53_s21, 0  ;;  %p67_p7 = scmp.eq.s32.totalorder %s189_s17, 15 }
  0x16   : > { %p72_p8 = scmp.ne.s32.totalorder %s305_s15, %s301_s14  ;;  %p73_p9 = scmp.eq.s32.totalorder %s190_s18, 15 }
  0x17   : > { %s368_s22 = scalar_select %p54_p6, %s309_s0, %s56_s20  }
  0x18   : > { %p370_p10 = por %p67_p7, %p66_p5  ;;  %p374_p11 = por %p73_p9, %p72_p8 }
  0x19   : > { %p193_p12 = scmp.ge.s32.totalorder %s313_s16, 1  ;;  %p99_p13 = scmp.lt.s32.totalorder %s313_s16, 17 }
  0x1b   : > { %p100_p0 = pnand %p193_p12, %p99_p13 }
  0x1c   : > { %s115_s25 = sand.u32 (!%p100_p0), 1, %s305_s15   ;;  %s117_s26 = sld [smem:[#allocation3 + %s189_s17]] (!%p100_p0)  ;;  %vm123_vm0 = vcmask (!%p100_p0), 122880  }
  0x1d   : > { %103 = sbr.rel (%p100_p0) target bundleno = 55 (0x37), region = 24  ;;  %s116_s27 = scalar_lea.vmem (!%p100_p0), [#allocation4], %s115_s25 }
  0x1e   : > { %s138_s28 = sshll.u32 (!%p100_p0), %s116_s27, 4  ;;  %s194_s29 = sshll.u32 (!%p100_p0), %s189_s17, 4  ;;  %s381_s28 = int_to_ptr.vmem [resolvable:$true] %s138_s28 }
  0x1f   : > { %s389_s7 = scalar_lea.hbm (!%p100_p0), %s431_s2, %s194_s29  ;;  %s126_s8 = scalar_lea.sflag (!%p100_p0), [#allocation5], %s115_s25 }
  0x20   : > { %s249_s9 = scalar_lea.vmem (!%p100_p0), %s381_s28, 16  ;;  %s316_s10 = smov (!%p100_p0), [#allocation4]  }
  0x21   : > { %p250_p2 = scmp.ne.s32.totalorder (!%p100_p0), %s381_s28, %s249_s9  ;;  %s253_s11 = sshll.u32 (!%p100_p0), %s316_s10, 4  ;;  %s254_s11 = int_to_ptr.vmem [resolvable:$false] %s253_s11 }
  0x22   : > { %p118_p1 = scmp.lt.s32.totalorder (!%p100_p0), %s117_s26, 19  ;;  %s255_s12 = scalar_lea.vmem (!%p100_p0), %s254_s11, 32 }
  0x23   : > { %p251_p3 = pnand (!%p100_p0), %p250_p2, %p370_p10  ;;  %p256_p5 = scmp.lt.s32.totalorder (!%p100_p0), %s381_s28, %s254_s11 }
  0x24   : > { %s439_s26 = smov (!%p118_p1, %s117_s26), 19  ;;  %p257_p6 = scmp.lt.s32.totalorder %s255_s12, %s249_s9 }
  0x25   : > { %s120_s4 = scalar_lea.vmem %s430_s1, %s439_s26  ;;  %p252_p4 = pneg %p251_p3 }
  0x26   : > { %v122_v0 = vld [vmem:[%s120_s4] sm:$0x1]  ;;  %p258_p7 = por %p257_p6, %p256_p5 }
  0x27   : > { %124 = vst.msk [vmem:[%s116_s27] sm:$0x1] %vm123_vm0, %v122_v0 }
  0x28   : > { %p259_p8 = pnand %p258_p7, %p252_p4 }
  0x2a   : > { %262 = shalt.err (!%p259_p8)
}
  0x2b   : > { %s263_s13 = scalar_lea.hbm %s389_s7, 16  ;;  %s267_s20 = scalar_lea.hbm %s431_s2, 256 }
  0x2c   : > { %p264_p9 = scmp.ne.s32.totalorder %s389_s7, %s263_s13  ;;  %p268_p0 = scmp.lt.u32.totalorder %s389_s7, %s431_s2 }
  0x2d   : > { %p269_p1 = scmp.lt.u32.totalorder %s267_s20, %s263_s13  ;;  %p271_p3 = scmp.lt.u32.totalorder %s263_s13, %s389_s7 }
  0x2e   : > { %p265_p12 = pnand %p264_p9, %p370_p10 }
  0x2f   : > { %p270_p2 = por %p269_p1, %p268_p0 }
  0x30   : > { %p266_p13 = pneg %p265_p12 }
  0x31   : > { %p272_p4 = por %p271_p3, %p270_p2 }
  0x33   : > { %p273_p5 = pnand %p272_p4, %p266_p13 }
  0x35   : > { %276 = shalt.err (!%p273_p5)
}
  0x36   : > { %197 = dma.vmem_to_hbm [thread:$0]  (%p370_p10), %s381_s28, 16, %s389_s7, %s126_s8  }
  0x37 PF: > { %p203_p6 = scmp.ge.s32.totalorder %s313_s16, 2  ;;  %s150_s26 = sand.u32 1, %s301_s14  }
  0x38   : > { %s151_s27 = scalar_lea.sflag [#allocation5], %s150_s26 }
  0x39   : > { %p200_p7 = pnand %p203_p6, %p374_p11 }
  0x3b   : > { %296 = dma.done.wait (!%p200_p7), %s151_s27, 16  }
  0x3c   : > { %298 = vsyncadd (!%p200_p7), %s151_s27, 4294967280  ;;  %p18_p8 = scmp.ge.s32.totalorder %s358_s19, 18   ;;  %s434_s14 = smov %s305_s15 }
  0x3d   : > { %s435_s15 = smov %s309_s0  ;;  %s436_s0 = smov %s368_s22 }
  0x3e   : > { %s437_s16 = smov %s358_s19  ;;  %20 = sbr.rel (!%p18_p8) target bundleno = 18 (0x12), region = 59 }
  0x45   :  { %155 = vsyncpa [#allocation5], 1 }
  0x46   :  { %157 = vsyncpa [#allocation5 + $0x1], 1 }

</bundles_post_ra>
